<compile_context>
chip_gen: v7x
topology: tpu7x:2x2x1
jax: 0.10.0
libtpu: 0.0.40
codegen_flags: <defaults>
</compile_context>

<pallas_src>
import jax
import jax.numpy as jnp
from jax.experimental import pallas as pl
from jax.experimental.pallas import tpu as pltpu


def _round_up(x, m):
    return ((x + m - 1) // m) * m


def _vmem_capacity_bytes():
    """Per-core VMEM capacity, with a conservative (v7x) fallback."""
    try:
        return int(pltpu.get_tpu_info().vmem_capacity_bytes)
    except Exception:
        return 64 * 1024 * 1024


# ----------------------------------------------------------------------------
# Pallas kernel: fused linear projection  y = x @ W + b
# ----------------------------------------------------------------------------
def _patch_merge_linear_kernel(x_ref, w_ref, b_ref, o_ref):
    y = jnp.dot(x_ref[...], w_ref[...], preferred_element_type=jnp.float32)
    o_ref[...] = (y + b_ref[...]).astype(o_ref.dtype)


def patch_merge_linear_pallas(x2d, w, b, *, out_dtype=None, tile_rows_max=2048):
    """Row-tiled (M, K) @ (K, N) + b with the weight resident in VMEM.

    * N is padded to a multiple of 128 (lane-dense output stores).
    * M is handled with a ragged grid (pl.cdiv) — no padding / slicing of M.
    """
    M, K = x2d.shape
    K2, N = w.shape
    assert K == K2, "weight / activation inner-dim mismatch"
    if out_dtype is None:
        out_dtype = x2d.dtype
    if b.ndim == 1:                       # accept nn.Linear-style (N,) bias
        b = b.reshape(1, -1)

    # ---- lane-dense output: pad N up to a multiple of 128 ------------------
    Np = _round_up(N, 128)
    if Np != N:
        w = jnp.pad(w, ((0, 0), (0, Np - N)))
        b = jnp.pad(b, ((0, 0), (0, Np - N)))

    act_b = jnp.dtype(x2d.dtype).itemsize
    w_b = jnp.dtype(w.dtype).itemsize
    bias_b = jnp.dtype(b.dtype).itemsize
    out_b = jnp.dtype(out_dtype).itemsize

    # ---- VMEM-aware row-tile selection -------------------------------------
    vmem_cap = _vmem_capacity_bytes()
    budget = int(0.4 * vmem_cap)                         # leave headroom
    fixed = 2 * (K * Np * w_b + Np * bias_b)             # weight + bias (dbl-buffered)
    per_row = 2 * (K * act_b + Np * out_b)               # activation + output (dbl-buffered)
    tm = int(max(8, min(tile_rows_max, (budget - fixed) // max(per_row, 1))))
    tm -= tm % 8
    tm = max(tm, 8)

    if M < 16:
        tm = M                                           # single full-extent block
    else:
        # prefer >= 2 grid steps so "parallel" shards across both TCs (v7x)
        tm = max(8, min(tm, _round_up(pl.cdiv(M, 2), 8)))

    grid = (pl.cdiv(M, tm),)

    vmem_limit = fixed + tm * per_row + (4 << 20)
    vmem_limit = int(min(vmem_cap, max(vmem_limit, 16 << 20)))

    cost = pl.CostEstimate(
        flops=2 * M * K * Np,
        transcendentals=0,
        bytes_accessed=M * K * act_b + K * Np * w_b + Np * bias_b + M * Np * out_b,
    )

    out = pl.pallas_call(
        _patch_merge_linear_kernel,
        out_shape=jax.ShapeDtypeStruct((M, Np), out_dtype),
        grid=grid,
        in_specs=[
            pl.BlockSpec((tm, K), lambda i: (i, 0)),     # activation row tile
            pl.BlockSpec((K, Np), lambda i: (0, 0)),     # weight: VMEM-resident
            pl.BlockSpec((1, Np), lambda i: (0, 0)),     # bias:   VMEM-resident
        ],
        out_specs=pl.BlockSpec((tm, Np), lambda i: (i, 0)),
        compiler_params=pltpu.CompilerParams(
            dimension_semantics=("parallel",),           # megacore / v7x 2-TC
            vmem_limit_bytes=vmem_limit,
        ),
        cost_estimate=cost,
    )(x2d, w, b)

    return out[:, :N] if Np != N else out


# ----------------------------------------------------------------------------
# PatchMerging forward
# ----------------------------------------------------------------------------
def patch_merging_forward(x, w, b, downscaling_factor, *, mxu_dtype=jnp.bfloat16):
    """x: (B, C, H, W) NCHW  ->  (B, H//df, W//df, out_channels).

    w: (C*df*df, out_channels)   (already transposed vs. torch's (out, in))
    b: (out_channels,) or (1, out_channels)
    """
    B, C, H, W = x.shape
    df = downscaling_factor
    nH, nW = H // df, W // df
    out_dtype = x.dtype

    # Cast BEFORE the relayout so XLA fuses the convert into the unfold
    # transpose; accumulation remains f32 inside the kernel.
    if mxu_dtype is not None:
        x = x.astype(mxu_dtype)
        w = w.astype(mxu_dtype)
        # bias kept in f32: negligible bytes, better accuracy.

    # nn.Unfold(kernel=stride=df) + view + permute, feature order (c, kh, kw):
    # (B,C,H,W) -> (B,C,nH,df,nW,df) -> (B,nH,nW,C,df,df) -> (B*nH*nW, C*df*df)
    xp = x.reshape(B, C, nH, df, nW, df).transpose(0, 2, 4, 1, 3, 5)
    x2d = xp.reshape(B * nH * nW, C * df * df)

    y2d = patch_merge_linear_pallas(x2d, w, b, out_dtype=out_dtype)
    return y2d.reshape(B, nH, nW, -1)


# ----------------------------------------------------------------------------
# Example / self-check
# ----------------------------------------------------------------------------
if __name__ == "__main__":
    # Small config: input (B=2, C=4, H=W=16), downscaling_factor=4, out_channels=32.
    B, C, H, W = 2, 4, 16, 16
    DF = 4
    OUT_CH = 32
    IN_DIM = C * DF * DF                       # 64

    key = jax.random.PRNGKey(0)
    kx, kw, kb = jax.random.split(key, 3)
    x = jax.random.normal(kx, (B, C, H, W), jnp.float32)
    # nn.Linear(IN_DIM, OUT_CH): stored here already transposed as (in, out).
    w = 0.05 * jax.random.normal(kw, (IN_DIM, OUT_CH), jnp.float32)
    b = 0.05 * jax.random.normal(kb, (OUT_CH,), jnp.float32)

    # pure-JAX reference of the same forward
    nH, nW = H // DF, W // DF
    x_unf = (x.reshape(B, C, nH, DF, nW, DF)
               .transpose(0, 2, 4, 1, 3, 5)
               .reshape(B, nH, nW, IN_DIM))
    ref = x_unf @ w + b

    # Exact-f32 MXU-operand path: tight check against the reference.
    y32 = jax.block_until_ready(patch_merging_forward(x, w, b, DF, mxu_dtype=None))
    assert y32.shape == (B, nH, nW, OUT_CH)
    assert jnp.allclose(y32, ref, atol=1e-5, rtol=1e-5)

    # Default bf16 MXU-operand path (f32 accumulation): relaxed tolerance.
    y = jax.block_until_ready(patch_merging_forward(x, w, b, DF))
    assert y.shape == (B, nH, nW, OUT_CH)
    assert jnp.all(jnp.isfinite(y))
    assert jnp.allclose(y, ref, atol=5e-2, rtol=5e-2)

    print("KERNEL_OK")
</pallas_src>

<mosaic_0001>
module attributes {stable_mosaic.version = 11 : i64} {
  func.func @_patch_merge_linear_kernel(%arg0: i32, %arg1: memref<16x64xf32, #tpu.memory_space<vmem>>, %arg2: memref<64x128xf32, #tpu.memory_space<vmem>>, %arg3: memref<1x128xf32, #tpu.memory_space<vmem>>, %arg4: memref<16x128xf32, #tpu.memory_space<vmem>>) attributes {dimension_semantics = [#tpu.dimension_semantics<parallel>], iteration_bounds = array<i64: 2>, scalar_prefetch = 0 : i64, scratch_operands = 0 : i64, tpu.core_type = #tpu.core_type<tc>, window_params = [{transform_indices = @transform_0, window_bounds = array<i64: 16, 64>}, {pipeline_mode = #tpu.pipeline_mode<synchronous>, transform_indices = @transform_1, window_bounds = array<i64: 64, 128>}, {pipeline_mode = #tpu.pipeline_mode<synchronous>, transform_indices = @transform_2, window_bounds = array<i64: 1, 128>}, {transform_indices = @transform_3, window_bounds = array<i64: 16, 128>}]} {
    %c0 = arith.constant 0 : index
    %c0_0 = arith.constant 0 : index
    %0 = vector.load %arg1[%c0, %c0_0] : memref<16x64xf32, #tpu.memory_space<vmem>>, vector<16x64xf32>
    %c0_1 = arith.constant 0 : index
    %c0_2 = arith.constant 0 : index
    %1 = vector.load %arg2[%c0_1, %c0_2] : memref<64x128xf32, #tpu.memory_space<vmem>>, vector<64x128xf32>
    %cst = arith.constant dense<0.000000e+00> : vector<16x128xf32>
    %2 = tpu.matmul %0, %1, %cst {dimension_numbers = #tpu.dot_dimension_numbers<[1], [0], [0], [1], [0, 0, 1, 1], [], []>} : vector<16x64xf32>, vector<64x128xf32>, vector<16x128xf32> -> vector<16x128xf32>
    %c0_3 = arith.constant 0 : index
    %c0_4 = arith.constant 0 : index
    %3 = vector.load %arg3[%c0_3, %c0_4] : memref<1x128xf32, #tpu.memory_space<vmem>>, vector<1x128xf32>
    %4 = vector.broadcast %3 : vector<1x128xf32> to vector<16x128xf32>
    %5 = arith.addf %2, %4 : vector<16x128xf32>
    %c0_5 = arith.constant 0 : index
    %c0_6 = arith.constant 0 : index
    %6 = vector.load %arg4[%c0_5, %c0_6] : memref<16x128xf32, #tpu.memory_space<vmem>>, vector<16x128xf32>
    tpu.vector_store %arg4[%c0_5, %c0_6], %5 {strides = array<i32>} : memref<16x128xf32, #tpu.memory_space<vmem>>, vector<16x128xf32>,
    return
  }
  func.func @transform_0(%arg0: i32) -> (i32, i32) {
    %c0_i32 = arith.constant 0 : i32
    %c0_i32_0 = arith.constant 0 : i32
    return %arg0, %c0_i32 : i32, i32
  }
  func.func @transform_1(%arg0: i32) -> (i32, i32) {
    %c0_i32 = arith.constant 0 : i32
    %c0_i32_0 = arith.constant 0 : i32
    %c0_i32_1 = arith.constant 0 : i32
    return %c0_i32, %c0_i32_0 : i32, i32
  }
  func.func @transform_2(%arg0: i32) -> (i32, i32) {
    %c0_i32 = arith.constant 0 : i32
    %c0_i32_0 = arith.constant 0 : i32
    %c0_i32_1 = arith.constant 0 : i32
    return %c0_i32, %c0_i32_0 : i32, i32
  }
  func.func @transform_3(%arg0: i32) -> (i32, i32) {
    %c0_i32 = arith.constant 0 : i32
    %c0_i32_0 = arith.constant 0 : i32
    return %arg0, %c0_i32 : i32, i32
  }
}

</mosaic_0001>

<bundles_post_ra>
// kernel: tpu_custom_call.1
= control target key start
LH: loop header
LB: loop body
LE: loop exit
PB: predicated region body
PF: predicated region fallthrough
CT: control target
= control target key end

     0   :  { %8 = vsyncpa [#allocation3], 0  ;;  %s904_s0 = inlined_call_operand.hbm [shape: f32[32,64], index: 0, kind: input, shape index: {}]   ;;  %s905_s1 = inlined_call_operand.hbm [shape: f32[64,128], index: 1, kind: input, shape index: {}]   ;;  %s906_s2 = inlined_call_operand.vmem [shape: f32[1,128], index: 2, kind: input, shape index: {}]   ;;  %s907_s3 = inlined_call_operand.hbm [shape: f32[32,128], index: 3, kind: output, shape index: {}]  }
   0x1   :  { %10 = vsyncpa [#allocation3 + $0x1], 0 }
   0x2   :  { %11 = vsyncpa [#allocation6], 0 }
   0x3   :  { %12 = vsyncpa [#allocation4], 0 }
   0x4   :  { %14 = vsyncpa [#allocation4 + $0x1], 0  ;;  %s688_s12 = smov 0   ;;  %s690_s13 = smov 0  }
   0x5   :  { %s692_s14 = smov 0   ;;  %s694_s15 = smov 0  }
   0x6 LB: > { %s709_s16 = sadd.s32 4294967295, %s659_s15   ;;  %s404_s17 = sadd.s32 4294967294, %s659_s15   ;;  %s659_s15 = sphi %s694_s15, %s927_s15   ;;  %s655_s14 = sphi %s692_s14, %s926_s14   ;;  %s651_s13 = sphi %s690_s13, %s925_s13   ;;  %s647_s12 = sphi %s688_s12, %s924_s12  }
   0x7   : > { %p40_p0 = scmp.ne.s32.totalorder %s651_s13, %s647_s12  ;;  %p908_p1 = scmp.eq.s32.totalorder %s709_s16, 0 }
   0x8   : > { %p112_p3 = scmp.eq.s32.totalorder %s404_s17, 1  ;;  %p405_p5 = scmp.ge.s32.totalorder %s659_s15, 1 }
   0x9   : > { %p718_p4 = por %p908_p1, %p40_p0  ;;  %p119_p7 = scmp.lt.s32.totalorder %s659_s15, 3 }
   0xa   : > { %p723_p6 = por %p112_p3, %p40_p0  ;;  %s661_s21 = smov [#allocation5]  }
   0xb   : > { %s911_s18 = scalar_select %p718_p4, 1, 0 }
   0xc   : > { %s912_s19 = scalar_select %p723_p6, 1, 0 }
   0xd   : > { %p728_p8 = pnand %p405_p5, %p119_p7  ;;  %s131_s22 = sshll.u32 %s661_s21, 4  ;;  %s732_s22 = int_to_ptr.vmem [resolvable:$true] %s131_s22 }
   0xe   : > { %s744_s24 = sadd.s32 1, %s659_s15   ;;  %s27_s25 = sadd.s32 1, %s655_s14 }
   0xf   : > { %s913_s20 = scalar_select %p728_p8, 1, 0 }
  0x10   : > { %p478_p9 = pneg %p728_p8  ;;  %s24_s26 = ssub.s32 %s659_s15, %s744_s24 }
  0x11   : > { %s531_s29 = scalar_lea.hbm %s905_s1, 1024 }
  0x12   : > { %p739_p11 = pnand %p478_p9, %p908_p1  ;;  %p532_p12 = scmp.ne.s32.totalorder %s905_s1, %s531_s29 }
  0x13   : > { %p538_p5 = scmp.lt.u32.totalorder %s531_s29, %s905_s1 }
  0x14   : > { %p533_p13 = pneg %p739_p11 }
  0x16   : > { %p534_p0 = pnand %p533_p13, %p532_p12 }
  0x18   : > { %p535_p3 = pneg %p534_p0 }
  0x1a   : > { %p540_p7 = pnand %p538_p5, %p535_p3 }
  0x1c   : > { %543 = shalt.err (!%p540_p7)
}
  0x1d   : > { %s544_s7 = scalar_lea.vmem %s732_s22, 1024  ;;  %p552_p2 = scmp.lt.s32.totalorder %s732_s22, %s732_s22 }
  0x1e   : > { %p545_p9 = scmp.ne.s32.totalorder %s732_s22, %s544_s7  ;;  %p553_p6 = scmp.lt.s32.totalorder %s544_s7, %s544_s7 }
  0x20   : > { %p547_p10 = pnand %p545_p9, %p533_p13  ;;  %p554_p4 = por %p553_p6, %p552_p2 }
  0x22   : > { %p548_p1 = pneg %p547_p10 }
  0x24   : > { %p555_p8 = pnand %p554_p4, %p548_p1 }
  0x26   : > { %558 = shalt.err (!%p555_p8)
}
  0x27   : > { %s662_s8 = smov 128   ;;  %s663_s9 = smov 8  }
  0x28   : > { %481 = dma.hbm_to_vmem [thread:$0]  (!%p739_p11), %s905_s1, 1024, %s732_s22, [#allocation6], %s662_s8, %s662_s8, %s663_s9  }
  0x29   : > { %p25_p1 = scmp.eq.s32.totalorder %s24_s26, 0  ;;  %p34_p2 = scmp.ne.s32.totalorder %s655_s14, %s651_s13 }
  0x2a   : > { %p35_p4 = scmp.eq.s32.totalorder %s659_s15, 0  ;;  %p491_p6 = scmp.lt.s32.totalorder %s659_s15, 2 }
  0x2b   : > { %s778_s17 = scalar_select %p25_p1, %s655_s14, %s27_s25  }
  0x2c   : > { %p36_p8 = por %p35_p4, %p34_p2  ;;  %p915_p10 = scmp.eq.s32.totalorder %s709_s16, 1 }
  0x2d   : > { %s148_s23 = sand.u32 1, %s655_s14   ;;  %s423_s27 = sshll.u32 %s659_s15, 8 }
  0x2e   : > { %p782_p12 = por %p915_p10, %p34_p2  ;;  %s408_s28 = sshll.u32 %s148_s23, 4 }
  0x2f   : > { %s791_s4 = scalar_lea.hbm %s904_s0, %s423_s27  ;;  %s152_s22 = scalar_lea.vmem [#allocation2], %s408_s28 }
  0x30   : > { %s159_s25 = sshll.u32 %s152_s22, 4  ;;  %p793_p11 = pnand %p491_p6, %p36_p8  ;;  %s797_s25 = int_to_ptr.vmem [resolvable:$true] %s159_s25 }
  0x31   : > { %s799_s5 = scalar_lea.sflag [#allocation3], %s148_s23  ;;  %s559_s6 = scalar_lea.hbm %s791_s4, 256 }
  0x32   : > { %p560_p13 = scmp.ne.s32.totalorder %s791_s4, %s559_s6  ;;  %p561_p0 = pneg %p793_p11 }
  0x33   : > { %s564_s11 = scalar_lea.hbm %s904_s0, 512  ;;  %p565_p7 = scmp.lt.u32.totalorder %s791_s4, %s904_s0 }
  0x34   : > { %p562_p3 = pnand %p561_p0, %p560_p13  ;;  %p566_p9 = scmp.lt.u32.totalorder %s564_s11, %s559_s6 }
  0x35   : > { %p568_p2 = scmp.lt.u32.totalorder %s559_s6, %s791_s4 }
  0x36   : > { %p563_p5 = pneg %p562_p3  ;;  %p567_p1 = por %p566_p9, %p565_p7 }
  0x38   : > { %p569_p4 = por %p568_p2, %p567_p1 }
  0x3a   : > { %p570_p6 = pnand %p569_p4, %p563_p5 }
  0x3c   : > { %573 = shalt.err (!%p570_p6)
}
  0x3d   : > { %s574_s23 = scalar_lea.vmem %s797_s25, 256  ;;  %s664_s29 = smov [#allocation2]  }
  0x3e   : > { %p575_p8 = scmp.ne.s32.totalorder %s797_s25, %s574_s23  ;;  %s579_s30 = sshll.u32 %s664_s29, 4  ;;  %s580_s30 = int_to_ptr.vmem [resolvable:$false] %s579_s30 }
  0x3f   : > { %s581_s22 = scalar_lea.vmem %s580_s30, 512  ;;  %p582_p3 = scmp.lt.s32.totalorder %s797_s25, %s580_s30 }
  0x40   : > { %p577_p10 = pnand %p575_p8, %p561_p0  ;;  %p583_p7 = scmp.lt.s32.totalorder %s581_s22, %s574_s23 }
  0x42   : > { %p578_p13 = pneg %p577_p10  ;;  %p584_p9 = por %p583_p7, %p582_p3 }
  0x44   : > { %p585_p1 = pnand %p584_p9, %p578_p13 }
  0x46   : > { %588 = shalt.err (!%p585_p1)
}
  0x47   : > { %485 = dma.hbm_to_vmem [thread:$0]  (!%p793_p11), %s791_s4, 256, %s797_s25, %s799_s5, %s662_s8, %s662_s8, %s663_s9  }
  0x48   : > { %p918_p0 = scmp.ne.s32.totalorder %s913_s20, 0 }
  0x49   : > { %s833_s6 = sand.u32 (!%p918_p0), 1, %s651_s13   ;;  %p919_p5 = scmp.ne.s32.totalorder (!%p918_p0), %s911_s18, 0 }
  0x4a   : > { %171 = sbr.rel (%p918_p0) target bundleno = 334 (0x14e), region = 32  ;;  %s412_s7 = sshll.u32 (!%p918_p0), %s833_s6, 4 }
  0x4b   : > { %s174_s10 = scalar_lea.sflag (!%p918_p0), [#allocation3], %s833_s6  ;;  %s177_s26 = scalar_lea.vmem (!%p918_p0), [#allocation2], %s412_s7 }
  0x51   : > { %634 = dma.done.wait (%p919_p5), %s174_s10, 256  }
  0x52   : > { %636 = vsyncadd (%p919_p5), %s174_s10, 4294967040  ;;  %p920_p11 = scmp.eq.s32.totalorder %s709_s16, 0 }
  0x54   : > { %638 = dma.done.wait (%p920_p11), [#allocation6], 1024   ;;  %p921_p2 = pmov %p920_p11 }
  0x55   : > { %v208_v0 = vld [vmem:[#allocation5] sm:$0xff]  ;;  %v209_v1 = vld [vmem:[#allocation5 + $0x8] sm:$0xff]  ;;  %v210_v2 = vld [vmem:[#allocation5 + $0x10] sm:$0xff]  ;;  %vm223_vm0 = vcmask 523264   ;;  %s203_s18 = scalar_lea.vmem [#allocation7], %s412_s7  ;;  %s424_s4 = sshll.u32 %s709_s16, 8 }
  0x56   : > { %640 = vsyncadd (%p921_p2), [#allocation6], 4294966272  ;;  %v454_v3 = vpack.c.bf16 %v209_v1, %v208_v0  ;;  %v211_v4 = vld [vmem:[#allocation5 + $0x18] sm:$0xff]  ;;  %v212_v6 = vld [vmem:[#allocation5 + $0x20] sm:$0xff]  ;;  %s321_s20 = sshll.u32 %s203_s18, 4  ;;  %s860_s11 = scalar_lea.hbm %s907_s3, %s424_s4  ;;  %s855_s20 = int_to_ptr.vmem [resolvable:$true] %s321_s20 }
  0x57   : > { %v458_v5 = vpack.c.bf16 %v211_v4, %v210_v2  ;;  %v213_v7 = vld [vmem:[#allocation5 + $0x28] sm:$0xff]  ;;  %v206_v8 = vld [vmem:[%s177_s26] sm:$0xff]  ;;  %v215_v11 = vld [vmem:[#allocation5 + $0x38] sm:$0xff]  ;;  %s308_s27 = scalar_lea.sflag [#allocation4], %s833_s6  ;;  %s589_s28 = scalar_lea.vmem %s855_s20, 256 }
  0x58   : > { %455 = vmatprep.subr.bf16.mxu0 %v454_v3  ;;  %451 = vmatprep.mubr.msk.f32.mxu0 %vm223_vm0, %v206_v8  ;;  %v462_v9 = vpack.c.bf16 %v213_v7, %v212_v6  ;;  %v214_v10 = vld [vmem:[#allocation5 + $0x30] sm:$0xff]  ;;  %v207_v13 = vld [vmem:[%s177_s26 + $0x8] sm:$0xff]  ;;  %v415_v14 = vld [vmem:[%s906_s2] ss:$0 sm:$0xff]  ;;  %p590_p4 = scmp.ne.s32.totalorder %s855_s20, %s589_s28  ;;  %s665_s16 = smov [#allocation7]  }
  0x59   : > { %457 = vmatpush3.bf16.msra.mxu0 %v454_v3  ;;  %v466_v12 = vpack.c.bf16 %v215_v11, %v214_v10  ;;  %s593_s23 = sshll.u32 %s665_s16, 4  ;;  %s594_s23 = int_to_ptr.vmem [resolvable:$false] %s593_s23 }
  0x5a   : > { %459 = vmatprep.subr.bf16.mxu0 %v458_v5  ;;  %p591_p6 = pnand %p590_p4, %p782_p12  ;;  %s595_s29 = scalar_lea.vmem %s594_s23, 512 }
  0x5b   : > { %p596_p10 = scmp.lt.s32.totalorder %s855_s20, %s594_s23  ;;  %p597_p13 = scmp.lt.s32.totalorder %s595_s29, %s589_s28 }
  0x5c   : > { %p592_p8 = pneg %p591_p6 }
  0x5d   : > { %461 = vmatpush3.bf16.msra.mxu0 %v458_v5  ;;  %p598_p3 = por %p597_p13, %p596_p10 }
  0x5e   : > { %463 = vmatprep.subr.bf16.mxu0 %v462_v9 }
  0x5f   : > { %p599_p7 = pnand %p598_p3, %p592_p8 }
  0x61   : > { %465 = vmatpush3.bf16.msra.mxu0 %v462_v9 }
  0x62   : > { %467 = vmatprep.subr.bf16.mxu0 %v466_v12 }
  0x65   : > { %469 = vmatpush3.bf16.msra.mxu0 %v466_v12 }
  0x68   : > { %452 = vmatmul.mubr.msk.f32.vlgmr.msra.gmra.mrb[0].mxu0 %vm223_vm0, %v207_v13 }
 0x13b   : > { %v453_v15 = vpop.f32.mrb[0].mxu0 }
 0x13c   : > { %v302_v16 = vadd.f32 %v453_v15, %v415_v14  ;;  %v296_v17 = vpop.f32.mrb[1].mxu0 }
 0x13d   : > { %v297_v18 = vadd.f32 %v415_v14, %v296_v17 }
 0x13e   : > { %306 = vst [vmem:[%s203_s18 + $0x8] sm:$0xff] %v302_v16 }
 0x13f   : > { %305 = vst [vmem:[%s203_s18] sm:$0xff] %v297_v18 }
 0x140   : > { %602 = shalt.err (!%p599_p7)
}
 0x141   : > { %s603_s30 = scalar_lea.hbm %s860_s11, 256  ;;  %s607_s10 = scalar_lea.hbm %s907_s3, 512 }
 0x142   : > { %p604_p9 = scmp.ne.s32.totalorder %s860_s11, %s603_s30  ;;  %p608_p5 = scmp.lt.u32.totalorder %s860_s11, %s907_s3 }
 0x143   : > { %p609_p11 = scmp.lt.u32.totalorder %s607_s10, %s603_s30  ;;  %p611_p4 = scmp.lt.u32.totalorder %s603_s30, %s860_s11 }
 0x144   : > { %p605_p1 = pnand %p604_p9, %p782_p12 }
 0x145   : > { %p610_p2 = por %p609_p11, %p608_p5 }
 0x146   : > { %p606_p0 = pneg %p605_p1 }
 0x147   : > { %p612_p6 = por %p611_p4, %p610_p2 }
 0x149   : > { %p613_p8 = pnand %p612_p6, %p606_p0 }
 0x14b   : > { %616 = shalt.err (!%p613_p8)
}
 0x14c   : > { %s666_s8 = smov 128   ;;  %s667_s9 = smov 8  }
 0x14d   : > { %476 = dma.vmem_to_hbm [thread:$0]  (%p782_p12), %s855_s20, 256, %s860_s11, %s308_s27, %s666_s8, %s666_s8, %s667_s9  }
 0x14e PF: > { %s336_s4 = sand.u32 1, %s647_s12   ;;  %p922_p10 = scmp.ne.s32.totalorder %s912_s19, 0 }
 0x14f   : > { %p923_p13 = scmp.ge.s32.totalorder %s659_s15, 2  ;;  %s337_s25 = scalar_lea.sflag [#allocation4], %s336_s4 }
 0x151   : > { %p487_p3 = pnand %p923_p13, %p922_p10 }
 0x153   : > { %642 = dma.done.wait (!%p487_p3), %s337_s25, 256  }
 0x154   : > { %644 = vsyncadd (!%p487_p3), %s337_s25, 4294967040  ;;  %p17_p7 = scmp.ge.s32.totalorder %s744_s24, 4   ;;  %s924_s12 = smov %s651_s13 }
 0x155   : > { %s925_s13 = smov %s655_s14  ;;  %s926_s14 = smov %s778_s17 }
 0x156   : > { %s927_s15 = smov %s744_s24  ;;  %19 = sbr.rel (!%p17_p7) target bundleno = 6 (0x6), region = 81 }
 0x15d   :  { %342 = vsyncpa [#allocation3], 1 }
 0x15e   :  { %344 = vsyncpa [#allocation3 + $0x1], 1 }
 0x15f   :  { %345 = vsyncpa [#allocation6], 1 }
 0x160   :  { %346 = vsyncpa [#allocation4], 1 }
 0x161   :  { %348 = vsyncpa [#allocation4 + $0x1], 1 }

</bundles_post_ra>
